<compile_context>
chip_gen: v6e
topology: v6e:2x2x1
jax: 0.10.0
libtpu: 0.0.40
codegen_flags: <defaults>
</compile_context>

<pallas_src>
import functools

import jax
import jax.numpy as jnp
import numpy as np
from jax.experimental import pallas as pl
from jax.experimental.pallas import tpu as pltpu


def _stupied_kernel(other_hbm, param_hbm, other_out, param_out, sem):
    # No compute touches the data: issue one HBM->HBM DMA per tensor
    # (no VMEM staging), overlap both transfers, then wait for completion.
    cp_other = pltpu.make_async_copy(other_hbm, other_out, sem.at[0])
    cp_param = pltpu.make_async_copy(param_hbm, param_out, sem.at[1])
    cp_other.start()
    cp_param.start()
    cp_other.wait()
    cp_param.wait()


@functools.lru_cache(maxsize=None)
def _build_stupied_call(other_shape, other_dtype, param_shape, param_dtype):
    """Build (once per signature) the jitted pallas_call for `Stupied`."""
    call = pl.pallas_call(
        _stupied_kernel,
        out_shape=(
            jax.ShapeDtypeStruct(other_shape, other_dtype),
            jax.ShapeDtypeStruct(param_shape, param_dtype),
        ),
        in_specs=[
            pl.BlockSpec(memory_space=pl.ANY),   # raw HBM ref, no auto-DMA
            pl.BlockSpec(memory_space=pl.ANY),
        ],
        out_specs=(
            pl.BlockSpec(memory_space=pl.ANY),
            pl.BlockSpec(memory_space=pl.ANY),
        ),
        scratch_shapes=[pltpu.SemaphoreType.DMA((2,))],
    )
    return jax.jit(call)


def _stupied_pallas(other, param):
    """Materialize (`other`, `param`) via a minimal HBM->HBM DMA kernel."""
    call = _build_stupied_call(
        tuple(other.shape), jnp.dtype(other.dtype),
        tuple(param.shape), jnp.dtype(param.dtype),
    )
    return call(other, param)


class Stupied:
    """JAX/Pallas mirror of the PyTorch `Stupied` module."""

    def __init__(self, param):
        self.param = param

    def forward(self, other):
        # Perf review: the reference performs no arithmetic, so the forward
        # path carries no kernel at all.  A single batched device_get fetches
        # both tensors in one sync round-trip, then prints them.
        other_host, param_host = jax.device_get((other, self.param))
        print(other_host)
        print(param_host)
        # TODO(synk): reference forward returns None (no output tensor).
        return None

    __call__ = forward


if __name__ == "__main__":
    key = jax.random.PRNGKey(0)
    k_other, k_param = jax.random.split(key)

    # Small deterministic inputs; lane dim kept at 128 (lane-dense).
    other = jax.random.normal(k_other, (8, 128), dtype=jnp.float32)
    param = jax.random.normal(k_param, (8, 128), dtype=jnp.float32)

    # Host-side golden copies for verification (single batched transfer).
    other_host, param_host = jax.device_get((other, param))
    other_host = np.asarray(other_host)
    param_host = np.asarray(param_host)

    # Run the Pallas kernel once, block on the result, check identity
    # semantics (bit-exact pass-through of both tensors).
    o_out, p_out = _stupied_pallas(other, param)
    jax.block_until_ready((o_out, p_out))
    o_host, p_host = jax.device_get((o_out, p_out))
    assert np.array_equal(np.asarray(o_host), other_host)
    assert np.array_equal(np.asarray(p_host), param_host)

    # Second call hits the memoized/jitted callable (no re-trace).
    o_out2, p_out2 = _stupied_pallas(other, param)
    jax.block_until_ready((o_out2, p_out2))

    # Exercise the module exactly like the PyTorch reference: prints both
    # tensors and returns None (kernel-free forward path, per perf review).
    module = Stupied(param)
    result = module(other)
    assert result is None

    print("KERNEL_OK")
</pallas_src>

<mosaic_0001>
module attributes {stable_mosaic.version = 11 : i64} {
  func.func @_stupied_kernel(%arg0: memref<8x128xf32, #tpu.memory_space<any>>, %arg1: memref<8x128xf32, #tpu.memory_space<any>>, %arg2: memref<8x128xf32, #tpu.memory_space<any>>, %arg3: memref<8x128xf32, #tpu.memory_space<any>>, %arg4: memref<2x!tpu.dma_semaphore, #tpu.memory_space<semaphore_mem>>) attributes {dimension_semantics = [], scalar_prefetch = 0 : i64, scratch_operands = 1 : i64, tpu.core_type = #tpu.core_type<tc>} {
    %c0_i32 = arith.constant 0 : i32
    %0 = tpu.memref_slice %arg4[%c0_i32] : memref<2x!tpu.dma_semaphore, #tpu.memory_space<semaphore_mem>> -> memref<1x!tpu.dma_semaphore, #tpu.memory_space<semaphore_mem>>
    %1 = tpu.memref_squeeze %0 : memref<1x!tpu.dma_semaphore, #tpu.memory_space<semaphore_mem>> -> memref<!tpu.dma_semaphore, #tpu.memory_space<semaphore_mem>>
    tpu.enqueue_dma source(%arg0 : memref<8x128xf32, #tpu.memory_space<any>>) target(%arg2 : memref<8x128xf32, #tpu.memory_space<any>>) target_semaphore(%1 : memref<!tpu.dma_semaphore, #tpu.memory_space<semaphore_mem>>)
    %c1_i32 = arith.constant 1 : i32
    %2 = tpu.memref_slice %arg4[%c1_i32] : memref<2x!tpu.dma_semaphore, #tpu.memory_space<semaphore_mem>> -> memref<1x!tpu.dma_semaphore, #tpu.memory_space<semaphore_mem>>
    %3 = tpu.memref_squeeze %2 : memref<1x!tpu.dma_semaphore, #tpu.memory_space<semaphore_mem>> -> memref<!tpu.dma_semaphore, #tpu.memory_space<semaphore_mem>>
    tpu.enqueue_dma source(%arg1 : memref<8x128xf32, #tpu.memory_space<any>>) target(%arg3 : memref<8x128xf32, #tpu.memory_space<any>>) target_semaphore(%3 : memref<!tpu.dma_semaphore, #tpu.memory_space<semaphore_mem>>)
    %c0_i32_0 = arith.constant 0 : i32
    %4 = tpu.memref_slice %arg4[%c0_i32_0] : memref<2x!tpu.dma_semaphore, #tpu.memory_space<semaphore_mem>> -> memref<1x!tpu.dma_semaphore, #tpu.memory_space<semaphore_mem>>
    %5 = tpu.memref_squeeze %4 : memref<1x!tpu.dma_semaphore, #tpu.memory_space<semaphore_mem>> -> memref<!tpu.dma_semaphore, #tpu.memory_space<semaphore_mem>>
    tpu.wait_dma2 semaphore(%5 : memref<!tpu.dma_semaphore, #tpu.memory_space<semaphore_mem>>) src(%arg0 : memref<8x128xf32, #tpu.memory_space<any>>) dst(%arg2 : memref<8x128xf32, #tpu.memory_space<any>>)
    %c1_i32_1 = arith.constant 1 : i32
    %6 = tpu.memref_slice %arg4[%c1_i32_1] : memref<2x!tpu.dma_semaphore, #tpu.memory_space<semaphore_mem>> -> memref<1x!tpu.dma_semaphore, #tpu.memory_space<semaphore_mem>>
    %7 = tpu.memref_squeeze %6 : memref<1x!tpu.dma_semaphore, #tpu.memory_space<semaphore_mem>> -> memref<!tpu.dma_semaphore, #tpu.memory_space<semaphore_mem>>
    tpu.wait_dma2 semaphore(%7 : memref<!tpu.dma_semaphore, #tpu.memory_space<semaphore_mem>>) src(%arg1 : memref<8x128xf32, #tpu.memory_space<any>>) dst(%arg3 : memref<8x128xf32, #tpu.memory_space<any>>)
    return
  }
}

</mosaic_0001>

<bundles_post_ra>
// kernel: tpu_custom_call.1
= control target key start
LH: loop header
LB: loop body
LE: loop exit
PB: predicated region body
PF: predicated region fallthrough
CT: control target
= control target key end

     0   :  { %s52_s12 = smov [#allocation2]   ;;  %s53_s13 = smov 131072   ;;  %s88_s0 = inlined_call_operand.hbm [shape: f32[8,128], index: 0, kind: input, shape index: {}]   ;;  %s89_s2 = inlined_call_operand.hbm [shape: f32[8,128], index: 2, kind: output, shape index: {0}]   ;;  %s90_s1 = inlined_call_operand.hbm [shape: f32[8,128], index: 1, kind: input, shape index: {}]   ;;  %s91_s3 = inlined_call_operand.hbm [shape: f32[8,128], index: 3, kind: output, shape index: {1}]  }
   0x1   :  { %s54_s14 = smov 0   ;;  %s55_s19 = smov [#allocation2 + $0x1]  }
   0x2   :  { %15 = dma.general %s88_s0, 128, %s89_s2, %s52_s12, %s53_s13, [#allocation4], %s54_s14, 0  }
   0x3   :  { %23 = dma.general %s90_s1, 128, %s91_s3, %s55_s19, %s53_s13, [#allocation6], %s54_s14, 0  }
   0x4   :  { %48 = dma.done.wait [#allocation2], 128 }
   0x5   :  { %49 = vsyncadd [#allocation2], 4294967168 }
   0x6   :  { %50 = dma.done.wait [#allocation2 + $0x1], 128 }
   0x7   :  { %51 = vsyncadd [#allocation2 + $0x1], 4294967168 }
   0x8   :  { %29 = vsyncmov [#allocation2] }
   0xb   :  { %s30_s24 = vpop.sfrf %29 }
   0xc   :  { %p42_p0 = scmp.ne.s32.totalorder %s30_s24, 0 }
   0xe   :  { %34 = shalt.err (%p42_p0)  }
   0xf   :  { %36 = vsyncmov [#allocation2 + $0x1] }
  0x12   :  { %s37_s25 = vpop.sfrf %36 }
  0x13   :  { %p43_p1 = scmp.ne.s32.totalorder %s37_s25, 0 }
  0x15   :  { %41 = shalt.err (%p43_p1)  }

</bundles_post_ra>
